<compile_context>
chip_gen: v6e
topology: v6e:2x2x1
jax: 0.10.0
libtpu: 0.0.40
codegen_flags: <defaults>
</compile_context>

<pallas_src>
import functools

import jax
import jax.numpy as jnp
from jax.experimental import pallas as pl
from jax.experimental.pallas import tpu as pltpu

_OFFSETS = [(-1, -1), (-1, 0), (-1, 1),
            (0, -1), (0, 0), (0, 1),
            (1, -1), (1, 0), (1, 1)]
_BN_EPS = 1e-5


# ------------------------------- kernel -------------------------------------

def _csc_kernel(x_ref, w1t_ref, b1_ref, wmask_ref, w2t_ref, b2_ref,
                w3at_ref, w3bt_ref, b3_ref, o_ref, *, width):
    """conv1(+folded BN) -> ReLU -> ASL (9 masked lane shifts) -> conv2
    -> concat/residual conv, all in channel-major (C, H*W) layout."""
    x = x_ref[0]                                                    # (Cin, N)

    # expand 1x1 conv; BN scale/bias already folded into w1t / b1; then ReLU
    h = jnp.dot(w1t_ref[...], x, preferred_element_type=jnp.float32) + b1_ref[...]
    h = jnp.maximum(h, 0.0)                                         # (E, N)

    # Active Shift Layer: per-channel bilinear translation == weighted sum of
    # 9 integer spatial shifts.  A shift by (dy, dx) on the row-major flat
    # H*W lane axis is a roll by -(dy*W + dx); wmask[k] = aslw[k, e] * valid[k, p]
    # zeroes out-of-image / row-wrapped positions and applies the per-channel
    # bilinear weight in one VPU multiply.
    acc = jnp.zeros_like(h)
    for k, (dy, dx) in enumerate(_OFFSETS):
        s = dy * width + dx
        shifted = h if s == 0 else jnp.roll(h, -s, axis=-1)
        acc = acc + wmask_ref[k] * shifted

    # project 1x1 conv
    y = jnp.dot(w2t_ref[...], acc, preferred_element_type=jnp.float32) + b2_ref[...]

    # concat([nn_out, residual], channel) followed by 1x1 conv == split matmul
    out = (jnp.dot(w3at_ref[...], y, preferred_element_type=jnp.float32)
           + jnp.dot(w3bt_ref[...], x, preferred_element_type=jnp.float32)
           + b3_ref[...])
    o_ref[0] = out                                                  # (Cout, N)


# --------------------------- glue / wrapper ----------------------------------

def _asl_weights(shifts):
    """Bilinear hat weights for the 9 integer offsets (exact for |shift| < 1)."""
    tx = shifts[:, 0]
    ty = shifts[:, 1]
    hat = lambda u: jnp.maximum(0.0, 1.0 - jnp.abs(u))
    rows = [hat(-ty - dy) * hat(-tx - dx) for (dy, dx) in _OFFSETS]
    return jnp.stack(rows, axis=0).astype(jnp.float32)             # (9, E)


def _valid_masks(H, W):
    """(9, H*W) validity masks for the 9 integer shifts (zero padding)."""
    r = jnp.arange(H * W)
    y, x = r // W, r % W
    rows = []
    for (dy, dx) in _OFFSETS:
        ok = (y + dy >= 0) & (y + dy < H) & (x + dx >= 0) & (x + dx < W)
        rows.append(ok)
    return jnp.stack(rows, axis=0).astype(jnp.float32)             # (9, N)


def csc_block_res2(x_nchw, params):
    w1, b1 = params["w1"], params["b1"]
    gamma, beta = params["gamma"], params["beta"]
    shifts = params["shifts"]
    w2, b2 = params["w2"], params["b2"]
    w3, b3 = params["w3"], params["b3"]

    x = x_nchw.astype(jnp.float32)
    B, Cin, H, W = x.shape
    N = H * W
    E = w1.shape[1]
    Cout = w2.shape[1]

    xf = x.reshape(B, Cin, N)            # NCHW with H*W flattened (lane-dense)

    # --- BatchNorm2d (training-mode) statistics, analytically from moments of
    # --- x (conv1 is linear).  Tiny (Cin x Cin) centered Gram in plain JAX,
    # --- folded into the conv1 weights so the kernel does no BN work.
    cnt = B * N
    mu = jnp.mean(xf, axis=(0, 2))                                  # (Cin,)
    xc = xf - mu[None, :, None]
    cov = jnp.einsum('bcn,bdn->cd', xc, xc) / cnt                   # (Cin, Cin)
    mean_h = mu @ w1 + b1                                           # (E,)
    var_h = jnp.einsum('ce,cd,de->e', w1, cov, w1)                  # biased var
    scale = gamma / jnp.sqrt(var_h + _BN_EPS)
    bias = beta - mean_h * scale
    w1f = w1 * scale[None, :]
    b1f = b1 * scale + bias

    # --- ASL bilinear weights fused with the boundary (zero-pad) masks
    aslw = _asl_weights(shifts)                                     # (9, E)
    valid = _valid_masks(H, W)                                      # (9, N)
    wmask = aslw[:, :, None] * valid[:, None, :]                    # (9, E, N)

    w3a, w3b = w3[:Cout], w3[Cout:]

    flops = 2 * B * N * (Cin * E + E * Cout + Cout * Cout + Cin * Cout) \
        + 2 * 9 * B * N * E
    bytes_accessed = 4 * (xf.size + B * Cout * N + wmask.size + w1f.size
                          + w2.size + w3.size + E + 3 * Cout)

    kernel = functools.partial(_csc_kernel, width=W)
    out_flat = pl.pallas_call(
        kernel,
        out_shape=jax.ShapeDtypeStruct((B, Cout, N), jnp.float32),
        grid_spec=pltpu.PrefetchScalarGridSpec(
            num_scalar_prefetch=0,
            grid=(B,),
            in_specs=[
                pl.BlockSpec((1, Cin, N), lambda b: (b, 0, 0)),      # x
                pl.BlockSpec((E, Cin), lambda b: (0, 0)),            # w1t (BN folded)
                pl.BlockSpec((E, 1), lambda b: (0, 0)),              # b1 (BN folded)
                pl.BlockSpec((9, E, N), lambda b: (0, 0, 0)),        # ASL weight*mask
                pl.BlockSpec((Cout, E), lambda b: (0, 0)),           # w2t
                pl.BlockSpec((Cout, 1), lambda b: (0, 0)),           # b2
                pl.BlockSpec((Cout, Cout), lambda b: (0, 0)),        # w3 (NN part)
                pl.BlockSpec((Cout, Cin), lambda b: (0, 0)),         # w3 (residual)
                pl.BlockSpec((Cout, 1), lambda b: (0, 0)),           # b3
            ],
            out_specs=pl.BlockSpec((1, Cout, N), lambda b: (b, 0, 0))),
        compiler_params=pltpu.CompilerParams(
            dimension_semantics=("parallel",)),
        cost_estimate=pl.CostEstimate(flops=flops, transcendentals=0,
                                      bytes_accessed=bytes_accessed),
    )(xf, w1f.T, b1f.reshape(E, 1), wmask, w2.T, b2.reshape(Cout, 1),
      w3a.T, w3b.T, b3.reshape(Cout, 1))

    return out_flat.reshape(B, Cout, H, W)                          # NCHW


# ------------------------- pure-JAX reference --------------------------------

def _reference(x_nchw, params):
    w1, b1 = params["w1"], params["b1"]
    gamma, beta = params["gamma"], params["beta"]
    w2, b2 = params["w2"], params["b2"]
    w3, b3 = params["w3"], params["b3"]
    x = jnp.transpose(x_nchw.astype(jnp.float32), (0, 2, 3, 1))
    B, H, W, Cin = x.shape
    E = w1.shape[1]
    Cout = w2.shape[1]

    xm = x.reshape(B * H * W, Cin)
    h = xm @ w1 + b1
    mean = h.mean(axis=0)
    var = ((h - mean) ** 2).mean(axis=0)
    h = (h - mean) / jnp.sqrt(var + _BN_EPS) * gamma + beta
    h = jnp.maximum(h, 0.0)

    h4 = h.reshape(B, H, W, E)
    hp = jnp.pad(h4, ((0, 0), (1, 1), (1, 1), (0, 0)))
    aslw = _asl_weights(params["shifts"])
    shifted = jnp.zeros_like(h4)
    for k, (dy, dx) in enumerate(_OFFSETS):
        shifted = shifted + aslw[k][None, None, None, :] * \
            hp[:, 1 + dy:1 + dy + H, 1 + dx:1 + dx + W, :]

    h = shifted.reshape(B * H * W, E)
    y = h @ w2 + b2
    out = jnp.concatenate([y, xm], axis=1) @ w3 + b3
    return jnp.transpose(out.reshape(B, H, W, Cout), (0, 3, 1, 2))


# ---------------------------------- main -------------------------------------

if __name__ == "__main__":
    key = jax.random.PRNGKey(0)
    ks = jax.random.split(key, 8)

    B, Cin, H, W = 2, 4, 16, 16
    expansion_rate = 2
    E = int(Cin * expansion_rate)   # expanded_size
    Cout = 8                        # output_size

    # Deterministic parameter init (shapes follow the PyTorch __init__;
    # Conv2d 1x1 weights stored directly as (in, out) matrices).
    params = dict(
        w1=jax.random.normal(ks[0], (Cin, E), jnp.float32) * 0.3,
        b1=jax.random.normal(ks[1], (E,), jnp.float32) * 0.1,
        gamma=jnp.ones((E,), jnp.float32),          # BatchNorm2d default init
        beta=jnp.zeros((E,), jnp.float32),
        shifts=jax.random.uniform(ks[2], (E, 2), jnp.float32,
                                  minval=-1.0, maxval=1.0),   # ASL shifts
        w2=jax.random.normal(ks[3], (E, Cout), jnp.float32) * 0.3,
        b2=jax.random.normal(ks[4], (Cout,), jnp.float32) * 0.1,
        w3=jax.random.normal(ks[5], (Cout + Cin, Cout), jnp.float32) * 0.3,
        b3=jax.random.normal(ks[6], (Cout,), jnp.float32) * 0.1,
    )
    x = jax.random.normal(ks[7], (B, Cin, H, W), jnp.float32)

    out = jax.block_until_ready(csc_block_res2(x, params))
    ref = jax.block_until_ready(_reference(x, params))

    assert out.shape == (B, Cout, H, W), out.shape
    assert jnp.allclose(out, ref, atol=1e-4, rtol=1e-4), \
        float(jnp.max(jnp.abs(out - ref)))
    print("KERNEL_OK")
</pallas_src>

<mosaic_0001>
module attributes {stable_mosaic.version = 11 : i64} {
  func.func @_csc_kernel(%arg0: i32, %arg1: memref<1x4x256xf32, #tpu.memory_space<vmem>>, %arg2: memref<8x4xf32, #tpu.memory_space<vmem>>, %arg3: memref<8x1xf32, #tpu.memory_space<vmem>>, %arg4: memref<9x8x256xf32, #tpu.memory_space<vmem>>, %arg5: memref<8x8xf32, #tpu.memory_space<vmem>>, %arg6: memref<8x1xf32, #tpu.memory_space<vmem>>, %arg7: memref<8x8xf32, #tpu.memory_space<vmem>>, %arg8: memref<8x4xf32, #tpu.memory_space<vmem>>, %arg9: memref<8x1xf32, #tpu.memory_space<vmem>>, %arg10: memref<1x8x256xf32, #tpu.memory_space<vmem>>) attributes {dimension_semantics = [#tpu.dimension_semantics<parallel>], iteration_bounds = array<i64: 2>, scalar_prefetch = 0 : i64, scratch_operands = 0 : i64, tpu.core_type = #tpu.core_type<tc>, window_params = [{transform_indices = @transform_0, window_bounds = array<i64: 1, 4, 256>}, {pipeline_mode = #tpu.pipeline_mode<synchronous>, transform_indices = @transform_1, window_bounds = array<i64: 8, 4>}, {pipeline_mode = #tpu.pipeline_mode<synchronous>, transform_indices = @transform_2, window_bounds = array<i64: 8, 1>}, {pipeline_mode = #tpu.pipeline_mode<synchronous>, transform_indices = @transform_3, window_bounds = array<i64: 9, 8, 256>}, {pipeline_mode = #tpu.pipeline_mode<synchronous>, transform_indices = @transform_4, window_bounds = array<i64: 8, 8>}, {pipeline_mode = #tpu.pipeline_mode<synchronous>, transform_indices = @transform_5, window_bounds = array<i64: 8, 1>}, {pipeline_mode = #tpu.pipeline_mode<synchronous>, transform_indices = @transform_6, window_bounds = array<i64: 8, 8>}, {pipeline_mode = #tpu.pipeline_mode<synchronous>, transform_indices = @transform_7, window_bounds = array<i64: 8, 4>}, {pipeline_mode = #tpu.pipeline_mode<synchronous>, transform_indices = @transform_8, window_bounds = array<i64: 8, 1>}, {transform_indices = @transform_9, window_bounds = array<i64: 1, 8, 256>}]} {
    %c0 = arith.constant 0 : index
    %c0_0 = arith.constant 0 : index
    %c0_1 = arith.constant 0 : index
    %0 = vector.load %arg1[%c0, %c0_0, %c0_1] : memref<1x4x256xf32, #tpu.memory_space<vmem>>, vector<1x4x256xf32>
    %1 = vector.shape_cast %0 : vector<1x4x256xf32> to vector<4x256xf32>
    %c0_2 = arith.constant 0 : index
    %c0_3 = arith.constant 0 : index
    %2 = vector.load %arg2[%c0_2, %c0_3] : memref<8x4xf32, #tpu.memory_space<vmem>>, vector<8x4xf32>
    %cst = arith.constant dense<0.000000e+00> : vector<8x256xf32>
    %3 = tpu.matmul %2, %1, %cst {dimension_numbers = #tpu.dot_dimension_numbers<[1], [0], [0], [1], [0, 0, 1, 1], [], []>} : vector<8x4xf32>, vector<4x256xf32>, vector<8x256xf32> -> vector<8x256xf32>
    %c0_4 = arith.constant 0 : index
    %c0_5 = arith.constant 0 : index
    %4 = vector.load %arg3[%c0_4, %c0_5] : memref<8x1xf32, #tpu.memory_space<vmem>>, vector<8x1xf32>
    %5 = vector.broadcast %4 : vector<8x1xf32> to vector<8x256xf32>
    %6 = arith.addf %3, %5 : vector<8x256xf32>
    %cst_6 = arith.constant 0.000000e+00 : f32
    %7 = vector.broadcast %cst_6 : f32 to vector<8x256xf32>
    %8 = arith.maximumf %6, %7 : vector<8x256xf32>
    %cst_7 = arith.constant 0.000000e+00 : f32
    %9 = vector.broadcast %cst_7 : f32 to vector<8x256xf32>
    %10 = vector.extract_strided_slice %8 {offsets = [0, 239], sizes = [8, 17], strides = [1, 1]} : vector<8x256xf32> to vector<8x17xf32>
    %11 = vector.extract_strided_slice %8 {offsets = [0, 0], sizes = [8, 239], strides = [1, 1]} : vector<8x256xf32> to vector<8x239xf32>
    %12 = tpu.concatenate %10, %11 in 1 : vector<8x17xf32>, vector<8x239xf32> -> vector<8x256xf32>
    %c0_8 = arith.constant 0 : index
    %c0_9 = arith.constant 0 : index
    %c0_10 = arith.constant 0 : index
    %13 = vector.load %arg4[%c0_8, %c0_9, %c0_10] : memref<9x8x256xf32, #tpu.memory_space<vmem>>, vector<1x8x256xf32>
    %14 = vector.shape_cast %13 : vector<1x8x256xf32> to vector<8x256xf32>
    %15 = arith.mulf %14, %12 : vector<8x256xf32>
    %16 = arith.addf %9, %15 : vector<8x256xf32>
    %17 = vector.extract_strided_slice %8 {offsets = [0, 240], sizes = [8, 16], strides = [1, 1]} : vector<8x256xf32> to vector<8x16xf32>
    %18 = vector.extract_strided_slice %8 {offsets = [0, 0], sizes = [8, 240], strides = [1, 1]} : vector<8x256xf32> to vector<8x240xf32>
    %19 = tpu.concatenate %17, %18 in 1 : vector<8x16xf32>, vector<8x240xf32> -> vector<8x256xf32>
    %c1 = arith.constant 1 : index
    %c0_11 = arith.constant 0 : index
    %c0_12 = arith.constant 0 : index
    %20 = vector.load %arg4[%c1, %c0_11, %c0_12] : memref<9x8x256xf32, #tpu.memory_space<vmem>>, vector<1x8x256xf32>
    %21 = vector.shape_cast %20 : vector<1x8x256xf32> to vector<8x256xf32>
    %22 = arith.mulf %21, %19 : vector<8x256xf32>
    %23 = arith.addf %16, %22 : vector<8x256xf32>
    %24 = vector.extract_strided_slice %8 {offsets = [0, 241], sizes = [8, 15], strides = [1, 1]} : vector<8x256xf32> to vector<8x15xf32>
    %25 = vector.extract_strided_slice %8 {offsets = [0, 0], sizes = [8, 241], strides = [1, 1]} : vector<8x256xf32> to vector<8x241xf32>
    %26 = tpu.concatenate %24, %25 in 1 : vector<8x15xf32>, vector<8x241xf32> -> vector<8x256xf32>
    %c2 = arith.constant 2 : index
    %c0_13 = arith.constant 0 : index
    %c0_14 = arith.constant 0 : index
    %27 = vector.load %arg4[%c2, %c0_13, %c0_14] : memref<9x8x256xf32, #tpu.memory_space<vmem>>, vector<1x8x256xf32>
    %28 = vector.shape_cast %27 : vector<1x8x256xf32> to vector<8x256xf32>
    %29 = arith.mulf %28, %26 : vector<8x256xf32>
    %30 = arith.addf %23, %29 : vector<8x256xf32>
    %31 = vector.extract_strided_slice %8 {offsets = [0, 255], sizes = [8, 1], strides = [1, 1]} : vector<8x256xf32> to vector<8x1xf32>
    %32 = vector.extract_strided_slice %8 {offsets = [0, 0], sizes = [8, 255], strides = [1, 1]} : vector<8x256xf32> to vector<8x255xf32>
    %33 = tpu.concatenate %31, %32 in 1 : vector<8x1xf32>, vector<8x255xf32> -> vector<8x256xf32>
    %c3 = arith.constant 3 : index
    %c0_15 = arith.constant 0 : index
    %c0_16 = arith.constant 0 : index
    %34 = vector.load %arg4[%c3, %c0_15, %c0_16] : memref<9x8x256xf32, #tpu.memory_space<vmem>>, vector<1x8x256xf32>
    %35 = vector.shape_cast %34 : vector<1x8x256xf32> to vector<8x256xf32>
    %36 = arith.mulf %35, %33 : vector<8x256xf32>
    %37 = arith.addf %30, %36 : vector<8x256xf32>
    %c4 = arith.constant 4 : index
    %c0_17 = arith.constant 0 : index
    %c0_18 = arith.constant 0 : index
    %38 = vector.load %arg4[%c4, %c0_17, %c0_18] : memref<9x8x256xf32, #tpu.memory_space<vmem>>, vector<1x8x256xf32>
    %39 = vector.shape_cast %38 : vector<1x8x256xf32> to vector<8x256xf32>
    %40 = arith.mulf %39, %8 : vector<8x256xf32>
    %41 = arith.addf %37, %40 : vector<8x256xf32>
    %42 = vector.extract_strided_slice %8 {offsets = [0, 1], sizes = [8, 255], strides = [1, 1]} : vector<8x256xf32> to vector<8x255xf32>
    %43 = vector.extract_strided_slice %8 {offsets = [0, 0], sizes = [8, 1], strides = [1, 1]} : vector<8x256xf32> to vector<8x1xf32>
    %44 = tpu.concatenate %42, %43 in 1 : vector<8x255xf32>, vector<8x1xf32> -> vector<8x256xf32>
    %c5 = arith.constant 5 : index
    %c0_19 = arith.constant 0 : index
    %c0_20 = arith.constant 0 : index
    %45 = vector.load %arg4[%c5, %c0_19, %c0_20] : memref<9x8x256xf32, #tpu.memory_space<vmem>>, vector<1x8x256xf32>
    %46 = vector.shape_cast %45 : vector<1x8x256xf32> to vector<8x256xf32>
    %47 = arith.mulf %46, %44 : vector<8x256xf32>
    %48 = arith.addf %41, %47 : vector<8x256xf32>
    %49 = vector.extract_strided_slice %8 {offsets = [0, 15], sizes = [8, 241], strides = [1, 1]} : vector<8x256xf32> to vector<8x241xf32>
    %50 = vector.extract_strided_slice %8 {offsets = [0, 0], sizes = [8, 15], strides = [1, 1]} : vector<8x256xf32> to vector<8x15xf32>
    %51 = tpu.concatenate %49, %50 in 1 : vector<8x241xf32>, vector<8x15xf32> -> vector<8x256xf32>
    %c6 = arith.constant 6 : index
    %c0_21 = arith.constant 0 : index
    %c0_22 = arith.constant 0 : index
    %52 = vector.load %arg4[%c6, %c0_21, %c0_22] : memref<9x8x256xf32, #tpu.memory_space<vmem>>, vector<1x8x256xf32>
    %53 = vector.shape_cast %52 : vector<1x8x256xf32> to vector<8x256xf32>
    %54 = arith.mulf %53, %51 : vector<8x256xf32>
    %55 = arith.addf %48, %54 : vector<8x256xf32>
    %56 = vector.extract_strided_slice %8 {offsets = [0, 16], sizes = [8, 240], strides = [1, 1]} : vector<8x256xf32> to vector<8x240xf32>
    %57 = vector.extract_strided_slice %8 {offsets = [0, 0], sizes = [8, 16], strides = [1, 1]} : vector<8x256xf32> to vector<8x16xf32>
    %58 = tpu.concatenate %56, %57 in 1 : vector<8x240xf32>, vector<8x16xf32> -> vector<8x256xf32>
    %c7 = arith.constant 7 : index
    %c0_23 = arith.constant 0 : index
    %c0_24 = arith.constant 0 : index
    %59 = vector.load %arg4[%c7, %c0_23, %c0_24] : memref<9x8x256xf32, #tpu.memory_space<vmem>>, vector<1x8x256xf32>
    %60 = vector.shape_cast %59 : vector<1x8x256xf32> to vector<8x256xf32>
    %61 = arith.mulf %60, %58 : vector<8x256xf32>
    %62 = arith.addf %55, %61 : vector<8x256xf32>
    %63 = vector.extract_strided_slice %8 {offsets = [0, 17], sizes = [8, 239], strides = [1, 1]} : vector<8x256xf32> to vector<8x239xf32>
    %64 = vector.extract_strided_slice %8 {offsets = [0, 0], sizes = [8, 17], strides = [1, 1]} : vector<8x256xf32> to vector<8x17xf32>
    %65 = tpu.concatenate %63, %64 in 1 : vector<8x239xf32>, vector<8x17xf32> -> vector<8x256xf32>
    %c8 = arith.constant 8 : index
    %c0_25 = arith.constant 0 : index
    %c0_26 = arith.constant 0 : index
    %66 = vector.load %arg4[%c8, %c0_25, %c0_26] : memref<9x8x256xf32, #tpu.memory_space<vmem>>, vector<1x8x256xf32>
    %67 = vector.shape_cast %66 : vector<1x8x256xf32> to vector<8x256xf32>
    %68 = arith.mulf %67, %65 : vector<8x256xf32>
    %69 = arith.addf %62, %68 : vector<8x256xf32>
    %c0_27 = arith.constant 0 : index
    %c0_28 = arith.constant 0 : index
    %70 = vector.load %arg5[%c0_27, %c0_28] : memref<8x8xf32, #tpu.memory_space<vmem>>, vector<8x8xf32>
    %cst_29 = arith.constant dense<0.000000e+00> : vector<8x256xf32>
    %71 = tpu.matmul %70, %69, %cst_29 {dimension_numbers = #tpu.dot_dimension_numbers<[1], [0], [0], [1], [0, 0, 1, 1], [], []>} : vector<8x8xf32>, vector<8x256xf32>, vector<8x256xf32> -> vector<8x256xf32>
    %c0_30 = arith.constant 0 : index
    %c0_31 = arith.constant 0 : index
    %72 = vector.load %arg6[%c0_30, %c0_31] : memref<8x1xf32, #tpu.memory_space<vmem>>, vector<8x1xf32>
    %73 = vector.broadcast %72 : vector<8x1xf32> to vector<8x256xf32>
    %74 = arith.addf %71, %73 : vector<8x256xf32>
    %c0_32 = arith.constant 0 : index
    %c0_33 = arith.constant 0 : index
    %75 = vector.load %arg7[%c0_32, %c0_33] : memref<8x8xf32, #tpu.memory_space<vmem>>, vector<8x8xf32>
    %cst_34 = arith.constant dense<0.000000e+00> : vector<8x256xf32>
    %76 = tpu.matmul %75, %74, %cst_34 {dimension_numbers = #tpu.dot_dimension_numbers<[1], [0], [0], [1], [0, 0, 1, 1], [], []>} : vector<8x8xf32>, vector<8x256xf32>, vector<8x256xf32> -> vector<8x256xf32>
    %c0_35 = arith.constant 0 : index
    %c0_36 = arith.constant 0 : index
    %77 = vector.load %arg8[%c0_35, %c0_36] : memref<8x4xf32, #tpu.memory_space<vmem>>, vector<8x4xf32>
    %cst_37 = arith.constant dense<0.000000e+00> : vector<8x256xf32>
    %78 = tpu.matmul %77, %1, %cst_37 {dimension_numbers = #tpu.dot_dimension_numbers<[1], [0], [0], [1], [0, 0, 1, 1], [], []>} : vector<8x4xf32>, vector<4x256xf32>, vector<8x256xf32> -> vector<8x256xf32>
    %79 = arith.addf %76, %78 : vector<8x256xf32>
    %c0_38 = arith.constant 0 : index
    %c0_39 = arith.constant 0 : index
    %80 = vector.load %arg9[%c0_38, %c0_39] : memref<8x1xf32, #tpu.memory_space<vmem>>, vector<8x1xf32>
    %81 = vector.broadcast %80 : vector<8x1xf32> to vector<8x256xf32>
    %82 = arith.addf %79, %81 : vector<8x256xf32>
    %c0_40 = arith.constant 0 : index
    %c0_41 = arith.constant 0 : index
    %c0_42 = arith.constant 0 : index
    %83 = vector.load %arg10[%c0_40, %c0_41, %c0_42] : memref<1x8x256xf32, #tpu.memory_space<vmem>>, vector<1x8x256xf32>
    %84 = vector.shape_cast %83 : vector<1x8x256xf32> to vector<8x256xf32>
    %85 = vector.shape_cast %82 : vector<8x256xf32> to vector<1x8x256xf32>
    tpu.vector_store %arg10[%c0_40, %c0_41, %c0_42], %85 {strides = array<i32>} : memref<1x8x256xf32, #tpu.memory_space<vmem>>, vector<1x8x256xf32>,
    return
  }
  func.func @transform_0(%arg0: i32) -> (i32, i32, i32) {
    %c0_i32 = arith.constant 0 : i32
    %c0_i32_0 = arith.constant 0 : i32
    %c0_i32_1 = arith.constant 0 : i32
    return %arg0, %c0_i32, %c0_i32_0 : i32, i32, i32
  }
  func.func @transform_1(%arg0: i32) -> (i32, i32) {
    %c0_i32 = arith.constant 0 : i32
    %c0_i32_0 = arith.constant 0 : i32
    %c0_i32_1 = arith.constant 0 : i32
    return %c0_i32, %c0_i32_0 : i32, i32
  }
  func.func @transform_2(%arg0: i32) -> (i32, i32) {
    %c0_i32 = arith.constant 0 : i32
    %c0_i32_0 = arith.constant 0 : i32
    %c0_i32_1 = arith.constant 0 : i32
    return %c0_i32, %c0_i32_0 : i32, i32
  }
  func.func @transform_3(%arg0: i32) -> (i32, i32, i32) {
    %c0_i32 = arith.constant 0 : i32
    %c0_i32_0 = arith.constant 0 : i32
    %c0_i32_1 = arith.constant 0 : i32
    %c0_i32_2 = arith.constant 0 : i32
    return %c0_i32, %c0_i32_0, %c0_i32_1 : i32, i32, i32
  }
  func.func @transform_4(%arg0: i32) -> (i32, i32) {
    %c0_i32 = arith.constant 0 : i32
    %c0_i32_0 = arith.constant 0 : i32
    %c0_i32_1 = arith.constant 0 : i32
    return %c0_i32, %c0_i32_0 : i32, i32
  }
  func.func @transform_5(%arg0: i32) -> (i32, i32) {
    %c0_i32 = arith.constant 0 : i32
    %c0_i32_0 = arith.constant 0 : i32
    %c0_i32_1 = arith.constant 0 : i32
    return %c0_i32, %c0_i32_0 : i32, i32
  }
  func.func @transform_6(%arg0: i32) -> (i32, i32) {
    %c0_i32 = arith.constant 0 : i32
    %c0_i32_0 = arith.constant 0 : i32
    %c0_i32_1 = arith.constant 0 : i32
    return %c0_i32, %c0_i32_0 : i32, i32
  }
  func.func @transform_7(%arg0: i32) -> (i32, i32) {
    %c0_i32 = arith.constant 0 : i32
    %c0_i32_0 = arith.constant 0 : i32
    %c0_i32_1 = arith.constant 0 : i32
    return %c0_i32, %c0_i32_0 : i32, i32
  }
  func.func @transform_8(%arg0: i32) -> (i32, i32) {
    %c0_i32 = arith.constant 0 : i32
    %c0_i32_0 = arith.constant 0 : i32
    %c0_i32_1 = arith.constant 0 : i32
    return %c0_i32, %c0_i32_0 : i32, i32
  }
  func.func @transform_9(%arg0: i32) -> (i32, i32, i32) {
    %c0_i32 = arith.constant 0 : i32
    %c0_i32_0 = arith.constant 0 : i32
    %c0_i32_1 = arith.constant 0 : i32
    return %arg0, %c0_i32, %c0_i32_0 : i32, i32, i32
  }
}

</mosaic_0001>

<bundles_post_ra>
// kernel: tpu_custom_call.1
= control target key start
LH: loop header
LB: loop body
LE: loop exit
PB: predicated region body
PF: predicated region fallthrough
CT: control target
= control target key end

     0   :  { %14 = vsyncpa [#allocation3], 0  ;;  %s1313_s0 = inlined_call_operand.vmem [shape: f32[2,4,256], index: 0, kind: input, shape index: {}]   ;;  %s1314_s1 = inlined_call_operand.vmem [shape: f32[8,4], index: 1, kind: input, shape index: {}]   ;;  %s1315_s2 = inlined_call_operand.vmem [shape: f32[8,1], index: 2, kind: input, shape index: {}]   ;;  %s1316_s3 = inlined_call_operand.hbm [shape: f32[9,8,256], index: 3, kind: input, shape index: {}]   ;;  %s1317_s4 = inlined_call_operand.vmem [shape: f32[8,8], index: 4, kind: input, shape index: {}]   ;;  %s1318_s5 = inlined_call_operand.vmem [shape: f32[8,1], index: 5, kind: input, shape index: {}]   ;;  %s1319_s6 = inlined_call_operand.vmem [shape: f32[8,8], index: 6, kind: input, shape index: {}]   ;;  %s1320_s7 = inlined_call_operand.vmem [shape: f32[8,4], index: 7, kind: input, shape index: {}]   ;;  %s1321_s8 = inlined_call_operand.vmem [shape: f32[8,1], index: 8, kind: input, shape index: {}]   ;;  %s1322_s9 = inlined_call_operand.hbm [shape: f32[2,8,256], index: 9, kind: output, shape index: {}]  }
   0x1   :  { %15 = vsyncpa [#allocation4], 0 }
   0x2   :  { %17 = vsyncpa [#allocation4 + $0x1], 0  ;;  %s1155_s30 = smov 0   ;;  %s1157_s10 = smov 0  }
   0x3   :  { %s1159_s11 = smov 0   ;;  %s1161_s12 = smov 0  }
   0x4 LB: > { %s1176_s13 = sadd.s32 4294967295, %s1089_s12   ;;  %s910_s14 = sadd.s32 4294967294, %s1089_s12   ;;  %s1089_s12 = sphi %s1161_s12, %s1330_s12   ;;  %s1085_s11 = sphi %s1159_s11, %s1329_s11   ;;  %s1081_s10 = sphi %s1157_s10, %s1328_s10   ;;  %s1077_s30 = sphi %s1155_s30, %s1327_s30  }
   0x5   : > { %s1180_s15 = sadd.s32 1, %s1089_s12   ;;  %s224_s16 = sadd.s32 1, %s1085_s11 }
   0x6   : > { %s221_s17 = ssub.s32 %s1089_s12, %s1180_s15  ;;  %p234_p0 = scmp.ne.s32.totalorder %s1085_s11, %s1081_s10 }
   0x7   : > { %p222_p1 = scmp.eq.s32.totalorder %s221_s17, 0  ;;  %p235_p2 = scmp.eq.s32.totalorder %s1176_s13, 1 }
   0x8   : > { %p240_p3 = scmp.ne.s32.totalorder %s1081_s10, %s1077_s30  ;;  %p241_p4 = scmp.eq.s32.totalorder %s910_s14, 1 }
   0x9   : > { %s1191_s18 = scalar_select %p222_p1, %s1085_s11, %s224_s16  }
   0xa   : > { %p1193_p5 = por %p235_p2, %p234_p0  ;;  %p1197_p6 = por %p241_p4, %p240_p3 }
   0xb   : > { %p911_p7 = scmp.ge.s32.totalorder %s1089_s12, 1  ;;  %p248_p8 = scmp.lt.s32.totalorder %s1089_s12, 3 }
   0xc   : > { %s1324_s20 = scalar_select %p1197_p6, 1, 0 }
   0xd   : > { %p948_p9 = scmp.eq.s32.totalorder %s1176_s13, 0  ;;  %p1204_p10 = pnand %p911_p7, %p248_p8 }
   0xe   : > { %s1091_s22 = smov [#allocation2]  }
   0xf   : > { %s266_s23 = sshll.u32 %s1091_s22, 4  ;;  %p940_p11 = pneg %p1204_p10  ;;  %s267_s23 = int_to_ptr.vmem [resolvable:$true] %s266_s23 }
  0x10   : > { %s1010_s24 = scalar_lea.vmem %s267_s23, 2304  ;;  %p1018_p3 = scmp.lt.s32.totalorder %s267_s23, %s267_s23 }
  0x11   : > { %p941_p12 = pnand %p948_p9, %p940_p11  ;;  %p1011_p0 = scmp.ne.s32.totalorder %s267_s23, %s1010_s24 }
  0x12   : > { %p1019_p4 = scmp.lt.s32.totalorder %s1010_s24, %s1010_s24 }
  0x13   : > { %p1001_p13 = pneg %p941_p12 }
  0x14   : > { %p1020_p6 = por %p1019_p4, %p1018_p3 }
  0x15   : > { %p1013_p1 = pnand %p1011_p0, %p1001_p13 }
  0x17   : > { %p1014_p2 = pneg %p1013_p1 }
  0x19   : > { %p1021_p7 = pnand %p1020_p6, %p1014_p2 }
  0x1b   : > { %1024 = shalt.err (!%p1021_p7)
}
  0x1c   : > { %s1092_s25 = smov 256   ;;  %s1093_s26 = smov 16  }
  0x1d   : > { %943 = dma.hbm_to_vmem [thread:$0]  (!%p941_p12), %s1316_s3, 2304, %s267_s23, [#allocation3], %s1092_s25, %s1092_s25, %s1093_s26  }
  0x1e   : > { %305 = sbr.rel (%p1204_p10) target bundleno = 805 (0x325), region = 56 }
  0x23   : > { %1068 = dma.done.wait (%p948_p9), [#allocation3], 2304  }
  0x24   : > { %1070 = vsyncadd (%p948_p9), [#allocation3], 4294964992  ;;  %p341_p8 = scmp.lt.s32.totalorder %s1176_s13, 1  ;;  %v1094_v0 = vmov 0.0   ;;  %v1095_v1 = vmov 0   ;;  %vm360_vm0 = vcmask 1043456  }
  0x25   : > { %429 = vmatprep.mubr.f32.mxu0 %v1094_v0  ;;  %657 = vmatprep.mubr.f32.mxu1 %v1094_v0  ;;  %v348_v3 = vld [vmem:[%s1315_s2] sm:$0xff]  ;;  %vm356_vm1 = vcmask 31744   ;;  %s1096_s26 = smov 16   ;;  %s1097_s27 = smov 17   ;;  %vm461_vm2 = vcmask 130048   ;;  %v467_v21 = vld [vmem:[#allocation2 + $0x10] sm:$0xff] }
  0x26   : > { %s342_s29 = scalar_select %p341_p8, %s1176_s13, 1  ;;  %996 = vset.pattern.permute.xlu0 %v1095_v1  ;;  %997 = vset.pattern.permute.xlu1 %v1095_v1  ;;  %v347_v5 = vld [vmem:[%s1314_s1] sm:$0xff]  ;;  %vm445_vm3 = vcmask 138240   ;;  %vm478_vm4 = vcmask 121856   ;;  %v468_v22 = vld [vmem:[#allocation2 + $0x18] sm:$0xff]  ;;  %v451_v26 = vld [vmem:[#allocation2 + $0x8] sm:$0xff] }
  0x27   : > { %351 = vperm.xlu0 %996, %v348_v3   ;;  %s1098_s28 = smov 15   ;;  %s1101_s16 = smov 113   ;;  %v814_v13 = vld [vmem:[%s1321_s8] sm:$0xff]  ;;  %vm495_vm5 = vcmask 7168   ;;  %v485_v32 = vld [vmem:[#allocation2 + $0x28] sm:$0xff]  ;;  %v501_v44 = vld [vmem:[#allocation2 + $0x30] sm:$0xff] }
  0x28   : > { %s932_s14 = sshll.u32 %s342_s29, 3  ;;  %s1099_s29 = smov 127   ;;  %v583_v14 = vld [vmem:[%s1318_s5] sm:$0xff]  ;;  %v502_v45 = vld [vmem:[#allocation2 + $0x38] sm:$0xff]  ;;  %vm518_vm6 = vcmask 1039360   ;;  %v509_v48 = vld [vmem:[#allocation2 + $0x48] sm:$0xff] }
  0x29   : > { %s345_s21 = scalar_lea.vmem %s1313_s0, %s932_s14  ;;  %s1100_s14 = smov 1   ;;  %v450_v25 = vld [vmem:[#allocation2] sm:$0xff]  ;;  %vm535_vm7 = vcmask 924672   ;;  %v525_v55 = vld [vmem:[#allocation2 + $0x50] sm:$0xff]  ;;  %v526_v56 = vld [vmem:[#allocation2 + $0x58] sm:$0xff]  ;;  %vm552_vm8 = vcmask 916480  }
  0x2a   : > { %v346_v2 = vld [vmem:[%s345_s21] sm:$0xff]  ;;  %s1102_s17 = smov 112   ;;  %s1103_s21 = smov 111   ;;  %v543_v3 = vld [vmem:[#allocation2 + $0x68] sm:$0xff]  ;;  %vm569_vm9 = vcmask 908288   ;;  %vm589_vm10 = vcmask 64512  }
  0x2b   : > { %v355_v4 = vcombine.high %v346_v2, %v346_v2  ;;  %v484_v31 = vld [vmem:[#allocation2 + $0x20] sm:$0xff]  ;;  %s933_s22 = sshll.u32 %s1176_s13, 8 }
  0x2c   : > { %v508_v47 = vld [vmem:[#allocation2 + $0x40] sm:$0xff] }
  0x2d   : > { %919 = vmatprep.subr.msk.mxu0 %vm360_vm0, %v355_v4 }
  0x2e   : > { %920 = vmatpush1.msk.msra.mxu0 %vm360_vm0, %v346_v2 }
  0x2f   : > { %921 = vmatmul.mubr.msk.f32.vlgmr.msra.gmra.mxu0 %vm356_vm1, %v347_v5  ;;  %923 = vmatprep.subr.msk.mxu0 %vm360_vm0, %v355_v4 }
  0x30   : > { %924 = vmatpush1.msk.msra.mxu0 %vm360_vm0, %v346_v2  ;;  %733 = vmatprep.mubr.f32.mxu0 %v1094_v0  ;;  %v542_v2 = vld [vmem:[#allocation2 + $0x60] sm:$0xff] }
  0xa2   : > { %v352_v6 = vpop.permute.xlu0 %351 }
  0xef   : > { %v431_v7 = vpop.f32.mrf.mxu0 }
  0xf0   : > { %v432_v8 = vadd.f32 %v431_v7, %v352_v6 }
  0xf1   : > { %v433_v10 = vpop.f32.mrf.mxu0 }
  0xf2   : > { %v1236_v9 = vmax.f32 %v432_v8, 0.0  ;;  %v434_v11 = vadd.f32 %v433_v10, %v352_v6 }
  0xf4   : > { %459 = vrot.lane.b32.xlu0 %v1236_v9, %s1096_s26  ;;  %443 = vrot.lane.b32.xlu1 %v1236_v9, %s1097_s27  ;;  %v1242_v12 = vmax.f32 %v434_v11, 0.0  ;;  %v510_v60 = vmul.f32 %v508_v47, %v1236_v9  ;;  %v559_v11 = vld [vmem:[#allocation2 + $0x70] sm:$0xff] }
  0xf6   : > { %v511_v59 = vmul.f32 %v509_v48, %v1242_v12 }
  0xf8   : > { %476 = vrot.lane.b32.xlu0 %v1236_v9, %s1098_s28  ;;  %514 = vrot.lane.b32.xlu1 %v1236_v9, %s1099_s29 }
  0xfc   : > { %493 = vrot.lane.b32.xlu0 %v1236_v9, %s1100_s14  ;;  %456 = vrot.lane.b32.xlu1 %v1242_v12, %s1096_s26 }
 0x100   : > { %439 = vrot.lane.b32.xlu0 %v1242_v12, %s1097_s27  ;;  %473 = vrot.lane.b32.xlu1 %v1242_v12, %s1098_s28  ;;  %s837_s27 = scalar_lea.hbm %s1322_s9, %s933_s22 }
 0x104   : > { %516 = vrot.lane.b32.xlu0 %v1242_v12, %s1099_s29  ;;  %490 = vrot.lane.b32.xlu1 %v1242_v12, %s1100_s14  ;;  %s1104_s14 = smov [#allocation5]  }
 0x105   : > { %s1029_s13 = sshll.u32 %s1104_s14, 4  ;;  %s1030_s13 = int_to_ptr.vmem [resolvable:$false] %s1029_s13 }
 0x108   : > { %533 = vrot.lane.b32.xlu0 %v1242_v12, %s1101_s16  ;;  %531 = vrot.lane.b32.xlu1 %v1236_v9, %s1101_s16  ;;  %s1031_s16 = scalar_lea.vmem %s1030_s13, 512 }
 0x10c   : > { %550 = vrot.lane.b32.xlu0 %v1242_v12, %s1102_s17  ;;  %548 = vrot.lane.b32.xlu1 %v1236_v9, %s1102_s17  ;;  %s338_s17 = sand.u32 1, %s1081_s10  }
 0x10d   : > { %s825_s28 = scalar_lea.sflag [#allocation4], %s338_s17 }
 0x110   : > { %567 = vrot.lane.b32.xlu0 %v1242_v12, %s1103_s21  ;;  %565 = vrot.lane.b32.xlu1 %v1236_v9, %s1103_s21  ;;  %s916_s21 = sshll.u32 %s338_s17, 4 }
 0x111   : > { %s340_s23 = scalar_lea.vmem [#allocation5], %s916_s21 }
 0x112   : > { %s839_s24 = sshll.u32 %s340_s23, 4  ;;  %s840_s24 = int_to_ptr.vmem [resolvable:$true] %s839_s24 }
 0x113   : > { %s1025_s29 = scalar_lea.vmem %s840_s24, 256  ;;  %p1032_p11 = scmp.lt.s32.totalorder %s840_s24, %s1030_s13 }
 0x114   : > { %817 = vperm.xlu0 %996, %v814_v13   ;;  %586 = vperm.xlu1 %997, %v583_v14   ;;  %v560_v13 = vld [vmem:[#allocation2 + $0x78] sm:$0xff]  ;;  %p1026_p6 = scmp.ne.s32.totalorder %s840_s24, %s1025_s29  ;;  %p1033_p12 = scmp.lt.s32.totalorder %s1031_s16, %s1025_s29 }
 0x116   : > { %p1027_p9 = pnand %p1026_p6, %p1193_p5  ;;  %p1034_p13 = por %p1033_p12, %p1032_p11 }
 0x118   : > { %p1028_p10 = pneg %p1027_p9 }
 0x11a   : > { %p1035_p0 = pnand %p1034_p13, %p1028_p10 }
 0x166   : > { %v460_v15 = vpop.permute.xlu0 %459  ;;  %v444_v16 = vpop.permute.xlu1 %443 }
 0x16a   : > { %v477_v17 = vpop.permute.xlu0 %476  ;;  %v515_v18 = vpop.permute.xlu1 %514 }
 0x16e   : > { %v494_v19 = vpop.permute.xlu0 %493  ;;  %v457_v20 = vpop.permute.xlu1 %456 }
 0x16f   : > { %v462_v23 = vsel %vm461_vm2, %v460_v15, %v457_v20  ;;  %v465_v24 = vsel %vm461_vm2, %v457_v20, %v460_v15 }
 0x170   : > { %v469_v35 = vmul.f32 %v467_v21, %v465_v24  ;;  %v470_v36 = vmul.f32 %v468_v22, %v462_v23  ;;  %v576_v23 = vld [vmem:[#allocation2 + $0x80] sm:$0xff] }
 0x172   : > { %v440_v27 = vpop.permute.xlu0 %439  ;;  %v474_v28 = vpop.permute.xlu1 %473 }
 0x173   : > { %v446_v29 = vsel %vm445_vm3, %v444_v16, %v440_v27  ;;  %v449_v30 = vsel %vm445_vm3, %v440_v27, %v444_v16  ;;  %v479_v33 = vsel %vm478_vm4, %v477_v17, %v474_v28  ;;  %v482_v34 = vsel %vm478_vm4, %v474_v28, %v477_v17 }
 0x174   : > { %v452_v37 = vmul.f32 %v450_v25, %v449_v30  ;;  %v453_v38 = vmul.f32 %v451_v26, %v446_v29  ;;  %v486_v41 = vmul.f32 %v484_v31, %v482_v34  ;;  %v487_v42 = vmul.f32 %v485_v32, %v479_v33  ;;  %v577_v25 = vld [vmem:[#allocation2 + $0x88] sm:$0xff] }
 0x176   : > { %v471_v39 = vadd.f32 %v469_v35, %v452_v37  ;;  %v472_v40 = vadd.f32 %v470_v36, %v453_v38  ;;  %v517_v43 = vpop.permute.xlu0 %516  ;;  %v491_v46 = vpop.permute.xlu1 %490  ;;  %v582_v36 = vld [vmem:[%s1317_s4] sm:$0xff] }
 0x177   : > { %v496_v49 = vsel %vm495_vm5, %v494_v19, %v491_v46  ;;  %v499_v50 = vsel %vm495_vm5, %v491_v46, %v494_v19  ;;  %v519_v57 = vsel %vm518_vm6, %v515_v18, %v517_v43  ;;  %v523_v58 = vsel %vm518_vm6, %v517_v43, %v515_v18  ;;  %v665_v37 = vld [vmem:[%s1320_s7] sm:$0xff] }
 0x178   : > { %v488_v51 = vadd.f32 %v486_v41, %v471_v39  ;;  %v489_v52 = vadd.f32 %v487_v42, %v472_v40  ;;  %v503_v53 = vmul.f32 %v501_v44, %v499_v50  ;;  %v504_v54 = vmul.f32 %v502_v45, %v496_v49  ;;  %925 = vmatmul.mubr.msk.f32.vlgmr.msra.gmra.mxu0 %vm356_vm1, %v665_v37  ;;  %v664_v43 = vld [vmem:[%s1319_s6] sm:$0xff] }
 0x179   : > { %v527_v6 = vmul.f32 %v525_v55, %v519_v57  ;;  %v528_v7 = vmul.f32 %v526_v56, %v523_v58 }
 0x17a   : > { %v534_v61 = vpop.permute.xlu0 %533  ;;  %v532_v62 = vpop.permute.xlu1 %531  ;;  %v505_v63 = vadd.f32 %v503_v53, %v488_v51  ;;  %v506_v1 = vadd.f32 %v504_v54, %v489_v52 }
 0x17b   : > { %v536_v4 = vsel %vm535_vm7, %v532_v62, %v534_v61  ;;  %v540_v5 = vsel %vm535_vm7, %v534_v61, %v532_v62 }
 0x17c   : > { %v512_v8 = vadd.f32 %v510_v60, %v505_v63  ;;  %v513_v10 = vadd.f32 %v511_v59, %v506_v1  ;;  %v544_v12 = vmul.f32 %v542_v2, %v536_v4  ;;  %v545_v14 = vmul.f32 %v543_v3, %v540_v5 }
 0x17e   : > { %v551_v9 = vpop.permute.xlu0 %550  ;;  %v549_v15 = vpop.permute.xlu1 %548  ;;  %v529_v16 = vadd.f32 %v527_v6, %v512_v8  ;;  %v530_v19 = vadd.f32 %v528_v7, %v513_v10 }
 0x17f   : > { %v553_v17 = vsel %vm552_vm8, %v549_v15, %v551_v9  ;;  %v557_v18 = vsel %vm552_vm8, %v551_v9, %v549_v15 }
 0x180   : > { %v561_v20 = vmul.f32 %v559_v11, %v553_v17  ;;  %v562_v21 = vmul.f32 %v560_v13, %v557_v18  ;;  %v546_v22 = vadd.f32 %v544_v12, %v529_v16  ;;  %v547_v24 = vadd.f32 %v545_v14, %v530_v19 }
 0x182   : > { %v568_v26 = vpop.permute.xlu0 %567  ;;  %v566_v27 = vpop.permute.xlu1 %565  ;;  %v564_v31 = vadd.f32 %v562_v21, %v547_v24  ;;  %v563_v33 = vadd.f32 %v561_v20, %v546_v22 }
 0x183   : > { %v570_v28 = vsel %vm569_vm9, %v566_v27, %v568_v26  ;;  %v574_v29 = vsel %vm569_vm9, %v568_v26, %v566_v27 }
 0x184   : > { %v578_v30 = vmul.f32 %v576_v23, %v570_v28  ;;  %v579_v32 = vmul.f32 %v577_v25, %v574_v29 }
 0x186   : > { %v581_v34 = vadd.f32 %v579_v32, %v564_v31  ;;  %v580_v35 = vadd.f32 %v578_v30, %v563_v33 }
 0x188   : > { %623 = vmatprep.subr.mxu1 %v581_v34 }
 0x189   : > { %624 = vmatpush1.msra.mxu1 %v580_v35 }
 0x18a   : > { %922 = vmatmul.mubr.msk.f32.vlgmr.msra.gmra.mxu1 %vm589_vm10, %v582_v36 }
 0x18b   : > { %807 = vmatprep.mubr.f32.mxu1 %v1094_v0 }
 0x18f   : > { %v587_v39 = vpop.permute.xlu1 %586  ;;  %v818_v45 = vpop.permute.xlu0 %817 }
 0x238   : > { %v735_v0 = vpop.f32.mrf.mxu0 }
 0x23a   : > { %v737_v47 = vpop.f32.mrf.mxu0 }
 0x24a   : > { %v659_v38 = vpop.f32.mrf.mxu1 }
 0x24b   : > { %v660_v42 = vadd.f32 %v659_v38, %v587_v39 }
 0x24c   : > { %v661_v40 = vpop.f32.mrf.mxu1 }
 0x24d   : > { %v662_v41 = vadd.f32 %v661_v40, %v587_v39 }
 0x24f   : > { %773 = vmatprep.subr.mxu1 %v662_v41 }
 0x250   : > { %774 = vmatpush1.msra.mxu1 %v660_v42 }
 0x251   : > { %926 = vmatmul.mubr.msk.f32.vlgmr.msra.gmra.mxu1 %vm589_vm10, %v664_v43 }
 0x311   : > { %v809_v44 = vpop.f32.mrf.mxu1 }
 0x312   : > { %v810_v46 = vadd.f32 %v809_v44, %v735_v0 }
 0x313   : > { %v811_v48 = vpop.f32.mrf.mxu1 }
 0x314   : > { %v820_v49 = vadd.f32 %v818_v45, %v810_v46  ;;  %v812_v50 = vadd.f32 %v811_v48, %v737_v47 }
 0x316   : > { %822 = vst [vmem:[%s340_s23] sm:$0xff] %v820_v49  ;;  %v821_v51 = vadd.f32 %v818_v45, %v812_v50 }
 0x318   : > { %823 = vst [vmem:[%s340_s23 + $0x8] sm:$0xff] %v821_v51 }
 0x319   : > { %1038 = shalt.err (!%p1035_p0)
}
 0x31a   : > { %s1039_s21 = scalar_lea.hbm %s837_s27, 256  ;;  %s1043_s23 = scalar_lea.hbm %s1322_s9, 512 }
 0x31b   : > { %p1040_p1 = scmp.ne.s32.totalorder %s837_s27, %s1039_s21  ;;  %p1044_p4 = scmp.lt.s32.totalorder %s837_s27, %s1322_s9 }
 0x31c   : > { %p1045_p7 = scmp.lt.s32.totalorder %s1043_s23, %s1039_s21 }
 0x31d   : > { %p1041_p2 = pnand %p1040_p1, %p1193_p5 }
 0x31e   : > { %p1046_p8 = por %p1045_p7, %p1044_p4 }
 0x31f   : > { %p1042_p3 = pneg %p1041_p2 }
 0x321   : > { %p1047_p6 = pnand %p1046_p8, %p1042_p3 }
 0x323   : > { %1050 = shalt.err (!%p1047_p6)
}
 0x324   : > { %938 = dma.vmem_to_hbm [thread:$0]  (%p1193_p5), %s840_s24, 256, %s837_s27, %s825_s28  }
 0x325 PF: > { %p950_p9 = scmp.ge.s32.totalorder %s1089_s12, 2  ;;  %s851_s29 = sand.u32 1, %s1077_s30  }
 0x326   : > { %p1326_p10 = scmp.ne.s32.totalorder %s1324_s20, 0  ;;  %s852_s14 = scalar_lea.sflag [#allocation4], %s851_s29 }
 0x328   : > { %p945_p11 = pnand %p950_p9, %p1326_p10 }
 0x32a   : > { %p946_p12 = pneg %p945_p11 }
 0x32c   : > { %1072 = dma.done.wait (%p946_p12), %s852_s14, 256  }
 0x32d   : > { %1074 = vsyncadd (%p946_p12), %s852_s14, 4294967040  ;;  %p20_p13 = scmp.ge.s32.totalorder %s1180_s15, 4   ;;  %s1327_s30 = smov %s1081_s10 }
 0x32e   : > { %s1328_s10 = smov %s1085_s11  ;;  %s1329_s11 = smov %s1191_s18 }
 0x32f   : > { %s1330_s12 = smov %s1180_s15  ;;  %22 = sbr.rel (!%p20_p13) target bundleno = 4 (0x4), region = 104 }
 0x334   :  { %857 = vsyncpa [#allocation3], 1 }
 0x335   :  { %859 = vsyncpa [#allocation3 + $0x1], 1 }
 0x336   :  { %860 = vsyncpa [#allocation4], 1 }
 0x337   :  { %862 = vsyncpa [#allocation4 + $0x1], 1 }

</bundles_post_ra>
